<compile_context>
chip_gen: v5e
topology: v5e:2x2
jax: 0.10.0
libtpu: 0.0.40
codegen_flags: <defaults>
</compile_context>

<pallas_src>
import functools

import jax
import jax.numpy as jnp
from jax.experimental import pallas as pl
from jax.experimental.pallas import tpu as pltpu


def _round_up(n, m):
    return ((n + m - 1) // m) * m


# ----------------------------------------------------------------------------
# Fused HIM kernel: all groups, all layers, heads + reparameterize in one call.
# ----------------------------------------------------------------------------
def _lstm_cell_zero_state(gates, H):
    # PyTorch LSTMCell gate order: i, f, g, o.  With h_prev = c_prev = 0 the
    # recurrent matmul and the forget-gate path (f * c_prev) are identically
    # zero; b_hh is already folded into `gates`' bias on the host.
    i_g = jax.nn.sigmoid(gates[:, 0 * H:1 * H])
    g_g = jnp.tanh(gates[:, 2 * H:3 * H])
    o_g = jax.nn.sigmoid(gates[:, 3 * H:4 * H])
    return o_g * jnp.tanh(i_g * g_g)


def _him_kernel(xa_ref, wx_ref, ws_ref, hs_ref, eps_ref, out_ref, *scratch,
                group, n_layers, hidden_size, output_size):
    H, O, G, L = hidden_size, output_size, group, n_layers
    GO = G * O
    Zp = _round_up((G - 1) * O, 8) if G > 1 else 0   # z-slab width (sublane rounded)
    LBLK = _round_up(H + 1, 8)                       # rows per (group, layer>=1) block
    HBLK = _round_up(H + 1, 8)                       # rows per head block
    wl_base = (G - 1) * Zp                           # start of layer>=1 blocks in ws

    zbuf = scratch[0] if scratch else None
    if zbuf is not None:
        zbuf[...] = jnp.zeros_like(zbuf)

    # ONE wide matmul (N = G*4H) for every group's layer-0 x-projection.
    # xa = [x | 1]; the last row of wx holds the folded layer-0 bias.
    gates_x = jnp.dot(xa_ref[...], wx_ref[...],
                      preferred_element_type=jnp.float32)

    for i in range(G):
        gates = gates_x[:, i * 4 * H:(i + 1) * 4 * H]
        if i > 0:
            # contribution of the previously produced z's (rows >= i*O are zero
            # in both the slab and the packed weight block).
            wz = ws_ref[(i - 1) * Zp:i * Zp, :]
            gates = gates + jnp.dot(zbuf[...], wz,
                                    preferred_element_type=jnp.float32)
        h = _lstm_cell_zero_state(gates, H)

        # remaining stacked LSTMCell layers (zero initial state each)
        for l in range(1, L):
            off = wl_base + (i * (L - 1) + (l - 1)) * LBLK
            gates = (jnp.dot(h, ws_ref[off:off + H, :],
                             preferred_element_type=jnp.float32)
                     + ws_ref[off + H:off + H + 1, :])
            h = _lstm_cell_zero_state(gates, H)

        # fused mu|logvar head: single (H, 2*O) matmul + bias row
        hoff = i * HBLK
        head = (jnp.dot(h, hs_ref[hoff:hoff + H, :],
                        preferred_element_type=jnp.float32)
                + hs_ref[hoff + H:hoff + H + 1, :])
        mu = head[:, :O]
        lv = head[:, O:]
        z = mu + eps_ref[:, i * O:(i + 1) * O] * jnp.exp(0.5 * lv)

        # direct slice stores into the single output slab [z | mu | logvar]
        out_ref[:, i * O:(i + 1) * O] = z
        out_ref[:, GO + i * O:GO + (i + 1) * O] = mu
        out_ref[:, 2 * GO + i * O:2 * GO + (i + 1) * O] = lv

        if i < G - 1:
            zbuf[:, i * O:(i + 1) * O] = z


def him_forward(x, packed, eps_all, *, group, n_layers, hidden_size,
                output_size, input_size):
    """Full HIM forward in ONE Pallas call; z/mu/logvar split outside."""
    B = x.shape[0]
    GO = group * output_size
    Zp = _round_up((group - 1) * output_size, 8) if group > 1 else 0

    # Pad batch to an f32 sublane multiple and pick a batch block; the grid is
    # parallel over batch blocks (uses both TensorCores on v7x for large B).
    block_b = min(_round_up(max(B, 1), 8), 128)
    Bp = _round_up(B, block_b)
    xa = jnp.concatenate([x, jnp.ones((B, 1), jnp.float32)], axis=-1)
    xa = jnp.pad(xa, ((0, Bp - B), (0, 0)))
    eps = jnp.pad(eps_all, ((0, Bp - B), (0, 0)))

    Din = input_size + 1
    kernel = functools.partial(
        _him_kernel, group=group, n_layers=n_layers, hidden_size=hidden_size,
        output_size=output_size)

    scratch_shapes = []
    if group > 1:
        scratch_shapes.append(pltpu.VMEM((block_b, Zp), jnp.float32))

    out = pl.pallas_call(
        kernel,
        out_shape=jax.ShapeDtypeStruct((Bp, 3 * GO), jnp.float32),
        grid_spec=pltpu.PrefetchScalarGridSpec(
            num_scalar_prefetch=0,
            grid=(Bp // block_b,),
            in_specs=[
                pl.BlockSpec((block_b, Din), lambda b: (b, 0)),
                pl.BlockSpec(packed["wx"].shape, lambda b: (0, 0)),
                pl.BlockSpec(packed["ws"].shape, lambda b: (0, 0)),
                pl.BlockSpec(packed["hs"].shape, lambda b: (0, 0)),
                pl.BlockSpec((block_b, GO), lambda b: (b, 0)),
            ],
            out_specs=pl.BlockSpec((block_b, 3 * GO), lambda b: (b, 0)),
            scratch_shapes=scratch_shapes,
        ),
        compiler_params=pltpu.CompilerParams(
            dimension_semantics=("parallel",)),
    )(xa, packed["wx"], packed["ws"], packed["hs"], eps)

    z = out[:B, :GO]
    mu = out[:B, GO:2 * GO]
    logvar = out[:B, 2 * GO:]
    return z, mu, logvar


# ----------------------------------------------------------------------------
# Parameter initialisation (PyTorch-style shapes, deterministic)
# ----------------------------------------------------------------------------
def init_gaussian_lstm_params(key, input_size, output_size, hidden_size, n_layers):
    ks = jax.random.split(key, 8 + 4 * n_layers)

    def uni(k, fan_in, shape):
        bound = 1.0 / (fan_in ** 0.5)
        return jax.random.uniform(k, shape, jnp.float32, -bound, bound)

    H, O = hidden_size, output_size
    p = {
        "embed_w": uni(ks[0], input_size, (input_size, H)),
        "embed_b": uni(ks[1], input_size, (1, H)),
        "mu_w": uni(ks[2], H, (H, O)),
        "mu_b": uni(ks[3], H, (1, O)),
        "lv_w": uni(ks[4], H, (H, O)),
        "lv_b": uni(ks[5], H, (1, O)),
    }
    w_ih, w_hh, b_ih, b_hh = [], [], [], []
    for l in range(n_layers):
        k0, k1, k2, k3 = ks[8 + 4 * l: 8 + 4 * l + 4]
        w_ih.append(uni(k0, H, (H, 4 * H)))   # NOTE: (in, 4H) orientation
        w_hh.append(uni(k1, H, (H, 4 * H)))
        b_ih.append(uni(k2, H, (1, 4 * H)))
        b_hh.append(uni(k3, H, (1, 4 * H)))
    p["w_ih"] = jnp.stack(w_ih)
    p["w_hh"] = jnp.stack(w_hh)
    p["b_ih"] = jnp.stack(b_ih)
    p["b_hh"] = jnp.stack(b_hh)
    return p


# ----------------------------------------------------------------------------
# Host-side folding/packing into the 3 lane-dense slabs the kernel consumes.
# ----------------------------------------------------------------------------
def fold_him_params(all_params, *, input_size, output_size, hidden_size,
                    n_layers, group):
    H, O, G, L = hidden_size, output_size, group, n_layers
    Zp = _round_up((G - 1) * O, 8) if G > 1 else 0
    LBLK = _round_up(H + 1, 8)
    HBLK = _round_up(H + 1, 8)

    wx_cols, b0_cols, wz_blocks, wl_blocks, hs_blocks = [], [], [], [], []
    for i, p in enumerate(all_params):
        # embed Linear folded into the layer-0 LSTMCell input projection
        w0 = p["embed_w"] @ p["w_ih"][0]                                   # (in_i, 4H)
        b0 = p["embed_b"] @ p["w_ih"][0] + p["b_ih"][0] + p["b_hh"][0]     # (1, 4H)
        wx_cols.append(w0[:input_size, :])                                 # x part
        b0_cols.append(b0)
        if i > 0:
            wz = w0[input_size:, :]                                        # (i*O, 4H)
            wz_blocks.append(jnp.pad(wz, ((0, Zp - i * O), (0, 0))))
        for l in range(1, L):
            blk = jnp.concatenate(
                [p["w_ih"][l], p["b_ih"][l] + p["b_hh"][l]], axis=0)       # (H+1, 4H)
            wl_blocks.append(jnp.pad(blk, ((0, LBLK - (H + 1)), (0, 0))))
        hblk = jnp.concatenate(
            [jnp.concatenate([p["mu_w"], p["lv_w"]], axis=-1),
             jnp.concatenate([p["mu_b"], p["lv_b"]], axis=-1)], axis=0)    # (H+1, 2O)
        hs_blocks.append(jnp.pad(hblk, ((0, HBLK - (H + 1)), (0, 0))))

    # (input_size+1, G*4H): all groups' x-projections side by side; last row = bias
    wx = jnp.concatenate(
        [jnp.concatenate(wx_cols, axis=-1),
         jnp.concatenate(b0_cols, axis=-1)], axis=0)
    ws_parts = wz_blocks + wl_blocks
    ws = (jnp.concatenate(ws_parts, axis=0) if ws_parts
          else jnp.zeros((8, 4 * H), jnp.float32))    # G==1, L==1: never read
    hs = jnp.concatenate(hs_blocks, axis=0)
    return {"wx": wx, "ws": ws, "hs": hs}


# ----------------------------------------------------------------------------
# Pure-JAX reference (full, un-folded math) for correctness check
# ----------------------------------------------------------------------------
def _gaussian_lstm_ref(x, p, eps, n_layers, hidden_size):
    H = hidden_size
    B = x.shape[0]
    h_in = x @ p["embed_w"] + p["embed_b"]
    for l in range(n_layers):
        h_prev = jnp.zeros((B, H), jnp.float32)
        c_prev = jnp.zeros((B, H), jnp.float32)
        gates = (h_in @ p["w_ih"][l] + p["b_ih"][l]
                 + h_prev @ p["w_hh"][l] + p["b_hh"][l])
        i_g = jax.nn.sigmoid(gates[:, 0 * H:1 * H])
        f_g = jax.nn.sigmoid(gates[:, 1 * H:2 * H])
        g_g = jnp.tanh(gates[:, 2 * H:3 * H])
        o_g = jax.nn.sigmoid(gates[:, 3 * H:4 * H])
        c_new = f_g * c_prev + i_g * g_g
        h_in = o_g * jnp.tanh(c_new)
    mu = h_in @ p["mu_w"] + p["mu_b"]
    lv = h_in @ p["lv_w"] + p["lv_b"]
    z = mu + eps * jnp.exp(0.5 * lv)
    return z, mu, lv


def him_ref(x, all_params, eps_list, group, n_layers, hidden_size):
    z, mu, lv = _gaussian_lstm_ref(x, all_params[0], eps_list[0], n_layers, hidden_size)
    for i in range(1, group):
        xi = jnp.concatenate((x, z), axis=-1)
        z_, mu_, lv_ = _gaussian_lstm_ref(xi, all_params[i], eps_list[i],
                                          n_layers, hidden_size)
        z = jnp.concatenate((z, z_), axis=-1)
        mu = jnp.concatenate((mu, mu_), axis=-1)
        lv = jnp.concatenate((lv, lv_), axis=-1)
    return z, mu, lv


if __name__ == "__main__":
    # Small shapes consistent with the module's forward
    input_size = 16
    output_size = 8
    hidden_size = 32
    n_layers = 2
    group = 2
    batch_size = 4

    key = jax.random.PRNGKey(0)
    k_x, k_p, k_e = jax.random.split(key, 3)

    x = jax.random.normal(k_x, (batch_size, input_size), jnp.float32)

    # per-group parameters: group i takes input_size + i*output_size features
    pkeys = jax.random.split(k_p, group)
    ekeys = jax.random.split(k_e, group)
    all_params, eps_list = [], []
    for i in range(group):
        in_i = input_size + i * output_size
        all_params.append(init_gaussian_lstm_params(
            pkeys[i], in_i, output_size, hidden_size, n_layers))
        # reparameterize noise (torch.randn_like equivalent), supplied from host
        eps_list.append(jax.random.normal(ekeys[i], (batch_size, output_size),
                                          jnp.float32))
    eps_all = jnp.concatenate(eps_list, axis=-1)   # (B, G*O) lane-dense

    packed = fold_him_params(
        all_params, input_size=input_size, output_size=output_size,
        hidden_size=hidden_size, n_layers=n_layers, group=group)

    z, mu, logvar = him_forward(
        x, packed, eps_all,
        group=group, n_layers=n_layers, hidden_size=hidden_size,
        output_size=output_size, input_size=input_size)
    jax.block_until_ready((z, mu, logvar))

    # correctness check against pure-JAX reference (un-folded math)
    z_r, mu_r, lv_r = him_ref(x, all_params, eps_list, group, n_layers, hidden_size)
    assert z.shape == (batch_size, group * output_size)
    assert mu.shape == (batch_size, group * output_size)
    assert logvar.shape == (batch_size, group * output_size)
    assert jnp.allclose(z, z_r, atol=1e-4), "z mismatch"
    assert jnp.allclose(mu, mu_r, atol=1e-4), "mu mismatch"
    assert jnp.allclose(logvar, lv_r, atol=1e-4), "logvar mismatch"

    print("KERNEL_OK")
</pallas_src>

<mosaic_0001>
module attributes {stable_mosaic.version = 11 : i64} {
  func.func @_him_kernel(%arg0: i32, %arg1: memref<8x17xf32, #tpu.memory_space<vmem>>, %arg2: memref<17x256xf32, #tpu.memory_space<vmem>>, %arg3: memref<88x128xf32, #tpu.memory_space<vmem>>, %arg4: memref<80x16xf32, #tpu.memory_space<vmem>>, %arg5: memref<8x16xf32, #tpu.memory_space<vmem>>, %arg6: memref<8x48xf32, #tpu.memory_space<vmem>>, %arg7: memref<8x8xf32, #tpu.memory_space<vmem>>) attributes {dimension_semantics = [#tpu.dimension_semantics<parallel>], iteration_bounds = array<i64: 1>, scalar_prefetch = 0 : i64, scratch_operands = 1 : i64, tpu.core_type = #tpu.core_type<tc>, window_params = [{transform_indices = @transform_0, window_bounds = array<i64: 8, 17>}, {pipeline_mode = #tpu.pipeline_mode<synchronous>, transform_indices = @transform_1, window_bounds = array<i64: 17, 256>}, {pipeline_mode = #tpu.pipeline_mode<synchronous>, transform_indices = @transform_2, window_bounds = array<i64: 88, 128>}, {pipeline_mode = #tpu.pipeline_mode<synchronous>, transform_indices = @transform_3, window_bounds = array<i64: 80, 16>}, {transform_indices = @transform_4, window_bounds = array<i64: 8, 16>}, {transform_indices = @transform_5, window_bounds = array<i64: 8, 48>}]} {
    %cst = arith.constant 0.000000e+00 : f32
    %0 = vector.broadcast %cst : f32 to vector<8x8xf32>
    %c0 = arith.constant 0 : index
    %c0_0 = arith.constant 0 : index
    %1 = vector.load %arg7[%c0, %c0_0] : memref<8x8xf32, #tpu.memory_space<vmem>>, vector<8x8xf32>
    tpu.vector_store %arg7[%c0, %c0_0], %0 {strides = array<i32>} : memref<8x8xf32, #tpu.memory_space<vmem>>, vector<8x8xf32>,
    %c0_1 = arith.constant 0 : index
    %c0_2 = arith.constant 0 : index
    %2 = vector.load %arg1[%c0_1, %c0_2] : memref<8x17xf32, #tpu.memory_space<vmem>>, vector<8x17xf32>
    %c0_3 = arith.constant 0 : index
    %c0_4 = arith.constant 0 : index
    %3 = vector.load %arg2[%c0_3, %c0_4] : memref<17x256xf32, #tpu.memory_space<vmem>>, vector<17x256xf32>
    %cst_5 = arith.constant dense<0.000000e+00> : vector<8x256xf32>
    %4 = tpu.matmul %2, %3, %cst_5 {dimension_numbers = #tpu.dot_dimension_numbers<[1], [0], [0], [1], [0, 0, 1, 1], [], []>} : vector<8x17xf32>, vector<17x256xf32>, vector<8x256xf32> -> vector<8x256xf32>
    %5 = vector.extract_strided_slice %4 {offsets = [0, 0], sizes = [8, 128], strides = [1, 1]} : vector<8x256xf32> to vector<8x128xf32>
    %6 = vector.extract_strided_slice %5 {offsets = [0, 0], sizes = [8, 32], strides = [1, 1]} : vector<8x128xf32> to vector<8x32xf32>
    %7 = arith.negf %6 : vector<8x32xf32>
    %8 = math.exp %7 : vector<8x32xf32>
    %cst_6 = arith.constant 1.000000e+00 : f32
    %9 = vector.broadcast %cst_6 : f32 to vector<8x32xf32>
    %10 = arith.addf %9, %8 : vector<8x32xf32>
    %11 = arith.divf %9, %10 : vector<8x32xf32>
    %12 = vector.extract_strided_slice %5 {offsets = [0, 64], sizes = [8, 32], strides = [1, 1]} : vector<8x128xf32> to vector<8x32xf32>
    %13 = math.tanh %12 : vector<8x32xf32>
    %14 = vector.extract_strided_slice %5 {offsets = [0, 96], sizes = [8, 32], strides = [1, 1]} : vector<8x128xf32> to vector<8x32xf32>
    %15 = arith.negf %14 : vector<8x32xf32>
    %16 = math.exp %15 : vector<8x32xf32>
    %cst_7 = arith.constant 1.000000e+00 : f32
    %17 = vector.broadcast %cst_7 : f32 to vector<8x32xf32>
    %18 = arith.addf %17, %16 : vector<8x32xf32>
    %19 = arith.divf %17, %18 : vector<8x32xf32>
    %20 = arith.mulf %11, %13 : vector<8x32xf32>
    %21 = math.tanh %20 : vector<8x32xf32>
    %22 = arith.mulf %19, %21 : vector<8x32xf32>
    %c8 = arith.constant 8 : index
    %c0_8 = arith.constant 0 : index
    %23 = vector.load %arg3[%c8, %c0_8] : memref<88x128xf32, #tpu.memory_space<vmem>>, vector<32x128xf32>
    %cst_9 = arith.constant dense<0.000000e+00> : vector<8x128xf32>
    %24 = tpu.matmul %22, %23, %cst_9 {dimension_numbers = #tpu.dot_dimension_numbers<[1], [0], [0], [1], [0, 0, 1, 1], [], []>} : vector<8x32xf32>, vector<32x128xf32>, vector<8x128xf32> -> vector<8x128xf32>
    %c40 = arith.constant 40 : index
    %c0_10 = arith.constant 0 : index
    %25 = vector.load %arg3[%c40, %c0_10] : memref<88x128xf32, #tpu.memory_space<vmem>>, vector<1x128xf32>
    %26 = vector.broadcast %25 : vector<1x128xf32> to vector<8x128xf32>
    %27 = arith.addf %24, %26 : vector<8x128xf32>
    %28 = vector.extract_strided_slice %27 {offsets = [0, 0], sizes = [8, 32], strides = [1, 1]} : vector<8x128xf32> to vector<8x32xf32>
    %29 = arith.negf %28 : vector<8x32xf32>
    %30 = math.exp %29 : vector<8x32xf32>
    %cst_11 = arith.constant 1.000000e+00 : f32
    %31 = vector.broadcast %cst_11 : f32 to vector<8x32xf32>
    %32 = arith.addf %31, %30 : vector<8x32xf32>
    %33 = arith.divf %31, %32 : vector<8x32xf32>
    %34 = vector.extract_strided_slice %27 {offsets = [0, 64], sizes = [8, 32], strides = [1, 1]} : vector<8x128xf32> to vector<8x32xf32>
    %35 = math.tanh %34 : vector<8x32xf32>
    %36 = vector.extract_strided_slice %27 {offsets = [0, 96], sizes = [8, 32], strides = [1, 1]} : vector<8x128xf32> to vector<8x32xf32>
    %37 = arith.negf %36 : vector<8x32xf32>
    %38 = math.exp %37 : vector<8x32xf32>
    %cst_12 = arith.constant 1.000000e+00 : f32
    %39 = vector.broadcast %cst_12 : f32 to vector<8x32xf32>
    %40 = arith.addf %39, %38 : vector<8x32xf32>
    %41 = arith.divf %39, %40 : vector<8x32xf32>
    %42 = arith.mulf %33, %35 : vector<8x32xf32>
    %43 = math.tanh %42 : vector<8x32xf32>
    %44 = arith.mulf %41, %43 : vector<8x32xf32>
    %c0_13 = arith.constant 0 : index
    %c0_14 = arith.constant 0 : index
    %45 = vector.load %arg4[%c0_13, %c0_14] : memref<80x16xf32, #tpu.memory_space<vmem>>, vector<32x16xf32>
    %cst_15 = arith.constant dense<0.000000e+00> : vector<8x16xf32>
    %46 = tpu.matmul %44, %45, %cst_15 {dimension_numbers = #tpu.dot_dimension_numbers<[1], [0], [0], [1], [0, 0, 1, 1], [], []>} : vector<8x32xf32>, vector<32x16xf32>, vector<8x16xf32> -> vector<8x16xf32>
    %c32 = arith.constant 32 : index
    %c0_16 = arith.constant 0 : index
    %47 = vector.load %arg4[%c32, %c0_16] : memref<80x16xf32, #tpu.memory_space<vmem>>, vector<1x16xf32>
    %48 = vector.broadcast %47 : vector<1x16xf32> to vector<8x16xf32>
    %49 = arith.addf %46, %48 : vector<8x16xf32>
    %50 = vector.extract_strided_slice %49 {offsets = [0, 0], sizes = [8, 8], strides = [1, 1]} : vector<8x16xf32> to vector<8x8xf32>
    %51 = vector.extract_strided_slice %49 {offsets = [0, 8], sizes = [8, 8], strides = [1, 1]} : vector<8x16xf32> to vector<8x8xf32>
    %c0_17 = arith.constant 0 : index
    %c0_18 = arith.constant 0 : index
    %52 = vector.load %arg5[%c0_17, %c0_18] : memref<8x16xf32, #tpu.memory_space<vmem>>, vector<8x8xf32>
    %cst_19 = arith.constant 5.000000e-01 : f32
    %53 = vector.broadcast %cst_19 : f32 to vector<8x8xf32>
    %54 = arith.mulf %53, %51 : vector<8x8xf32>
    %55 = math.exp %54 : vector<8x8xf32>
    %56 = arith.mulf %52, %55 : vector<8x8xf32>
    %57 = arith.addf %50, %56 : vector<8x8xf32>
    %c0_20 = arith.constant 0 : index
    %c0_21 = arith.constant 0 : index
    %58 = vector.load %arg6[%c0_20, %c0_21] : memref<8x48xf32, #tpu.memory_space<vmem>>, vector<8x8xf32>
    tpu.vector_store %arg6[%c0_20, %c0_21], %57 {strides = array<i32>} : memref<8x48xf32, #tpu.memory_space<vmem>>, vector<8x8xf32>,
    %c0_22 = arith.constant 0 : index
    %c16 = arith.constant 16 : index
    %59 = vector.load %arg6[%c0_22, %c16] : memref<8x48xf32, #tpu.memory_space<vmem>>, vector<8x8xf32>
    tpu.vector_store %arg6[%c0_22, %c16], %50 {strides = array<i32>} : memref<8x48xf32, #tpu.memory_space<vmem>>, vector<8x8xf32>,
    %c0_23 = arith.constant 0 : index
    %c32_24 = arith.constant 32 : index
    %60 = vector.load %arg6[%c0_23, %c32_24] : memref<8x48xf32, #tpu.memory_space<vmem>>, vector<8x8xf32>
    tpu.vector_store %arg6[%c0_23, %c32_24], %51 {strides = array<i32>} : memref<8x48xf32, #tpu.memory_space<vmem>>, vector<8x8xf32>,
    %c0_25 = arith.constant 0 : index
    %c0_26 = arith.constant 0 : index
    %61 = vector.load %arg7[%c0_25, %c0_26] : memref<8x8xf32, #tpu.memory_space<vmem>>, vector<8x8xf32>
    tpu.vector_store %arg7[%c0_25, %c0_26], %57 {strides = array<i32>} : memref<8x8xf32, #tpu.memory_space<vmem>>, vector<8x8xf32>,
    %62 = vector.extract_strided_slice %4 {offsets = [0, 128], sizes = [8, 128], strides = [1, 1]} : vector<8x256xf32> to vector<8x128xf32>
    %c0_27 = arith.constant 0 : index
    %c0_28 = arith.constant 0 : index
    %63 = vector.load %arg3[%c0_27, %c0_28] : memref<88x128xf32, #tpu.memory_space<vmem>>, vector<8x128xf32>
    %c0_29 = arith.constant 0 : index
    %c0_30 = arith.constant 0 : index
    %64 = vector.load %arg7[%c0_29, %c0_30] : memref<8x8xf32, #tpu.memory_space<vmem>>, vector<8x8xf32>
    %cst_31 = arith.constant dense<0.000000e+00> : vector<8x128xf32>
    %65 = tpu.matmul %64, %63, %cst_31 {dimension_numbers = #tpu.dot_dimension_numbers<[1], [0], [0], [1], [0, 0, 1, 1], [], []>} : vector<8x8xf32>, vector<8x128xf32>, vector<8x128xf32> -> vector<8x128xf32>
    %66 = arith.addf %62, %65 : vector<8x128xf32>
    %67 = vector.extract_strided_slice %66 {offsets = [0, 0], sizes = [8, 32], strides = [1, 1]} : vector<8x128xf32> to vector<8x32xf32>
    %68 = arith.negf %67 : vector<8x32xf32>
    %69 = math.exp %68 : vector<8x32xf32>
    %cst_32 = arith.constant 1.000000e+00 : f32
    %70 = vector.broadcast %cst_32 : f32 to vector<8x32xf32>
    %71 = arith.addf %70, %69 : vector<8x32xf32>
    %72 = arith.divf %70, %71 : vector<8x32xf32>
    %73 = vector.extract_strided_slice %66 {offsets = [0, 64], sizes = [8, 32], strides = [1, 1]} : vector<8x128xf32> to vector<8x32xf32>
    %74 = math.tanh %73 : vector<8x32xf32>
    %75 = vector.extract_strided_slice %66 {offsets = [0, 96], sizes = [8, 32], strides = [1, 1]} : vector<8x128xf32> to vector<8x32xf32>
    %76 = arith.negf %75 : vector<8x32xf32>
    %77 = math.exp %76 : vector<8x32xf32>
    %cst_33 = arith.constant 1.000000e+00 : f32
    %78 = vector.broadcast %cst_33 : f32 to vector<8x32xf32>
    %79 = arith.addf %78, %77 : vector<8x32xf32>
    %80 = arith.divf %78, %79 : vector<8x32xf32>
    %81 = arith.mulf %72, %74 : vector<8x32xf32>
    %82 = math.tanh %81 : vector<8x32xf32>
    %83 = arith.mulf %80, %82 : vector<8x32xf32>
    %c48 = arith.constant 48 : index
    %c0_34 = arith.constant 0 : index
    %84 = vector.load %arg3[%c48, %c0_34] : memref<88x128xf32, #tpu.memory_space<vmem>>, vector<32x128xf32>
    %cst_35 = arith.constant dense<0.000000e+00> : vector<8x128xf32>
    %85 = tpu.matmul %83, %84, %cst_35 {dimension_numbers = #tpu.dot_dimension_numbers<[1], [0], [0], [1], [0, 0, 1, 1], [], []>} : vector<8x32xf32>, vector<32x128xf32>, vector<8x128xf32> -> vector<8x128xf32>
    %c80 = arith.constant 80 : index
    %c0_36 = arith.constant 0 : index
    %86 = vector.load %arg3[%c80, %c0_36] : memref<88x128xf32, #tpu.memory_space<vmem>>, vector<1x128xf32>
    %87 = vector.broadcast %86 : vector<1x128xf32> to vector<8x128xf32>
    %88 = arith.addf %85, %87 : vector<8x128xf32>
    %89 = vector.extract_strided_slice %88 {offsets = [0, 0], sizes = [8, 32], strides = [1, 1]} : vector<8x128xf32> to vector<8x32xf32>
    %90 = arith.negf %89 : vector<8x32xf32>
    %91 = math.exp %90 : vector<8x32xf32>
    %cst_37 = arith.constant 1.000000e+00 : f32
    %92 = vector.broadcast %cst_37 : f32 to vector<8x32xf32>
    %93 = arith.addf %92, %91 : vector<8x32xf32>
    %94 = arith.divf %92, %93 : vector<8x32xf32>
    %95 = vector.extract_strided_slice %88 {offsets = [0, 64], sizes = [8, 32], strides = [1, 1]} : vector<8x128xf32> to vector<8x32xf32>
    %96 = math.tanh %95 : vector<8x32xf32>
    %97 = vector.extract_strided_slice %88 {offsets = [0, 96], sizes = [8, 32], strides = [1, 1]} : vector<8x128xf32> to vector<8x32xf32>
    %98 = arith.negf %97 : vector<8x32xf32>
    %99 = math.exp %98 : vector<8x32xf32>
    %cst_38 = arith.constant 1.000000e+00 : f32
    %100 = vector.broadcast %cst_38 : f32 to vector<8x32xf32>
    %101 = arith.addf %100, %99 : vector<8x32xf32>
    %102 = arith.divf %100, %101 : vector<8x32xf32>
    %103 = arith.mulf %94, %96 : vector<8x32xf32>
    %104 = math.tanh %103 : vector<8x32xf32>
    %105 = arith.mulf %102, %104 : vector<8x32xf32>
    %c40_39 = arith.constant 40 : index
    %c0_40 = arith.constant 0 : index
    %106 = vector.load %arg4[%c40_39, %c0_40] : memref<80x16xf32, #tpu.memory_space<vmem>>, vector<32x16xf32>
    %cst_41 = arith.constant dense<0.000000e+00> : vector<8x16xf32>
    %107 = tpu.matmul %105, %106, %cst_41 {dimension_numbers = #tpu.dot_dimension_numbers<[1], [0], [0], [1], [0, 0, 1, 1], [], []>} : vector<8x32xf32>, vector<32x16xf32>, vector<8x16xf32> -> vector<8x16xf32>
    %c72 = arith.constant 72 : index
    %c0_42 = arith.constant 0 : index
    %108 = vector.load %arg4[%c72, %c0_42] : memref<80x16xf32, #tpu.memory_space<vmem>>, vector<1x16xf32>
    %109 = vector.broadcast %108 : vector<1x16xf32> to vector<8x16xf32>
    %110 = arith.addf %107, %109 : vector<8x16xf32>
    %111 = vector.extract_strided_slice %110 {offsets = [0, 0], sizes = [8, 8], strides = [1, 1]} : vector<8x16xf32> to vector<8x8xf32>
    %112 = vector.extract_strided_slice %110 {offsets = [0, 8], sizes = [8, 8], strides = [1, 1]} : vector<8x16xf32> to vector<8x8xf32>
    %c0_43 = arith.constant 0 : index
    %c8_44 = arith.constant 8 : index
    %113 = vector.load %arg5[%c0_43, %c8_44] : memref<8x16xf32, #tpu.memory_space<vmem>>, vector<8x8xf32>
    %cst_45 = arith.constant 5.000000e-01 : f32
    %114 = vector.broadcast %cst_45 : f32 to vector<8x8xf32>
    %115 = arith.mulf %114, %112 : vector<8x8xf32>
    %116 = math.exp %115 : vector<8x8xf32>
    %117 = arith.mulf %113, %116 : vector<8x8xf32>
    %118 = arith.addf %111, %117 : vector<8x8xf32>
    %c0_46 = arith.constant 0 : index
    %c8_47 = arith.constant 8 : index
    %119 = vector.load %arg6[%c0_46, %c8_47] : memref<8x48xf32, #tpu.memory_space<vmem>>, vector<8x8xf32>
    tpu.vector_store %arg6[%c0_46, %c8_47], %118 {strides = array<i32>} : memref<8x48xf32, #tpu.memory_space<vmem>>, vector<8x8xf32>,
    %c0_48 = arith.constant 0 : index
    %c24 = arith.constant 24 : index
    %120 = vector.load %arg6[%c0_48, %c24] : memref<8x48xf32, #tpu.memory_space<vmem>>, vector<8x8xf32>
    tpu.vector_store %arg6[%c0_48, %c24], %111 {strides = array<i32>} : memref<8x48xf32, #tpu.memory_space<vmem>>, vector<8x8xf32>,
    %c0_49 = arith.constant 0 : index
    %c40_50 = arith.constant 40 : index
    %121 = vector.load %arg6[%c0_49, %c40_50] : memref<8x48xf32, #tpu.memory_space<vmem>>, vector<8x8xf32>
    tpu.vector_store %arg6[%c0_49, %c40_50], %112 {strides = array<i32>} : memref<8x48xf32, #tpu.memory_space<vmem>>, vector<8x8xf32>,
    return
  }
  func.func @transform_0(%arg0: i32) -> (i32, i32) {
    %c0_i32 = arith.constant 0 : i32
    %c0_i32_0 = arith.constant 0 : i32
    return %arg0, %c0_i32 : i32, i32
  }
  func.func @transform_1(%arg0: i32) -> (i32, i32) {
    %c0_i32 = arith.constant 0 : i32
    %c0_i32_0 = arith.constant 0 : i32
    %c0_i32_1 = arith.constant 0 : i32
    return %c0_i32, %c0_i32_0 : i32, i32
  }
  func.func @transform_2(%arg0: i32) -> (i32, i32) {
    %c0_i32 = arith.constant 0 : i32
    %c0_i32_0 = arith.constant 0 : i32
    %c0_i32_1 = arith.constant 0 : i32
    return %c0_i32, %c0_i32_0 : i32, i32
  }
  func.func @transform_3(%arg0: i32) -> (i32, i32) {
    %c0_i32 = arith.constant 0 : i32
    %c0_i32_0 = arith.constant 0 : i32
    %c0_i32_1 = arith.constant 0 : i32
    return %c0_i32, %c0_i32_0 : i32, i32
  }
  func.func @transform_4(%arg0: i32) -> (i32, i32) {
    %c0_i32 = arith.constant 0 : i32
    %c0_i32_0 = arith.constant 0 : i32
    return %arg0, %c0_i32 : i32, i32
  }
  func.func @transform_5(%arg0: i32) -> (i32, i32) {
    %c0_i32 = arith.constant 0 : i32
    %c0_i32_0 = arith.constant 0 : i32
    return %arg0, %c0_i32 : i32, i32
  }
}

</mosaic_0001>

<bundles_post_ra>
// kernel: tpu_custom_call.1
= control target key start
LH: loop header
LB: loop body
LE: loop exit
PB: predicated region body
PF: predicated region fallthrough
CT: control target
= control target key end

     0   :  { %10 = vsyncpa [#allocation4], 0  ;;  %s757_s0 = inlined_call_operand.vmem [shape: f32[8,17], index: 0, kind: input, shape index: {}]   ;;  %s758_s1 = inlined_call_operand.hbm [shape: f32[17,256], index: 1, kind: input, shape index: {}]   ;;  %s759_s2 = inlined_call_operand.vmem [shape: f32[88,128], index: 2, kind: input, shape index: {}]   ;;  %s760_s3 = inlined_call_operand.vmem [shape: f32[80,16], index: 3, kind: input, shape index: {}]   ;;  %s761_s4 = inlined_call_operand.hbm [shape: f32[8,16], index: 4, kind: input, shape index: {}]   ;;  %s762_s5 = inlined_call_operand.hbm [shape: f32[8,48], index: 5, kind: output, shape index: {}]  }
   0x1   :  { %11 = vsyncpa [#allocation7], 0 }
   0x2   :  { %12 = vsyncpa [#allocation5], 0  ;;  %s19_s20 = sshll.u32 %s758_s1, 4  ;;  %s597_s21 = smov [#allocation3]   ;;  %s20_s20 = int_to_ptr.hbm [resolvable:$true] %s19_s20 }
   0x3   :  { %s21_s22 = sshll.u32 %s597_s21, 4  ;;  %s37_s25 = sshll.u32 %s761_s4, 4  ;;  %s22_s22 = int_to_ptr.vmem [resolvable:$true] %s21_s22  ;;  %s38_s25 = int_to_ptr.hbm [resolvable:$true] %s37_s25 }
   0x4   :  { %s598_s26 = smov 256   ;;  %s599_s27 = smov 16  }
   0x5   :  { %27 = dma.hbm_to_vmem [thread:$0]  %s20_s20, 768, %s22_s22, [#allocation4], %s598_s26, %s598_s26, %s599_s27  }
   0x6   :  { %s600_s28 = smov [#allocation6]  }
   0x7   :  { %s39_s29 = sshll.u32 %s600_s28, 4  ;;  %s40_s29 = int_to_ptr.vmem [resolvable:$true] %s39_s29 }
   0x8   :  { %42 = dma.hbm_to_vmem [thread:$0]  %s38_s25, 128, %s40_s29, [#allocation7]  }
   0x9   :  { %591 = dma.done.wait [#allocation4], 768  }
   0xa   :  { %592 = vsyncadd [#allocation4], 4294966528 }
   0xb   :  { %593 = dma.done.wait [#allocation7], 128  }
   0xc   :  { %594 = vsyncadd [#allocation7], 4294967168  ;;  %vm64_vm0 = vcmask 1040384   ;;  %v58_v0 = vld [vmem:[#allocation3 + $0x20] sm:$0x1]  ;;  %v56_v1 = vld [vmem:[#allocation3 + $0x10] sm:$0xff] }
   0xd   :  { %454 = vmatpush.msk.msra.mxu0 %vm64_vm0, %v58_v0  ;;  %v54_v2 = vld [vmem:[#allocation3] sm:$0xff]  ;;  %v650_v3 = vld [vmem:[%s757_s0] sm:$0xff]  ;;  %vm60_vm1 = vcmask 138240   ;;  %s601_s30 = smov 64   ;;  %s602_s0 = smov 96   ;;  %v144_v23 = vld [vmem:[%s759_s2 + $0x18] sm:$0xff] }
   0xe   :  { %v145_v22 = vld [vmem:[%s759_s2 + $0x20] sm:$0xff]  ;;  %v143_v24 = vld [vmem:[%s759_s2 + $0x10] sm:$0xff]  ;;  %v142_v25 = vld [vmem:[%s759_s2 + $0x8] sm:$0xff]  ;;  %s603_s14 = smov 32   ;;  %vm151_vm6 = vcmask 261120   ;;  %s604_s28 = smov 120  }
   0xf   :  { %85 = vmatpush.msra.mxu0 %v56_v1  ;;  %166 = vmatpush.msra.mxu2 %v145_v22  ;;  %v479_v29 = vld [vmem:[%s759_s2 + $0x28] ss:$0 sm:$0xff]  ;;  %v208_v49 = vld [vmem:[%s760_s3 + $0x18] sm:$0xff]  ;;  %v207_v50 = vld [vmem:[%s760_s3 + $0x10] sm:$0xff]  ;;  %vm51_vm11 = vcmask 64512   ;;  %v605_v1 = vmov 0.0  }
  0x10   :  { %228 = vmatpush.msra.mxu3 %v208_v49  ;;  %v206_v51 = vld [vmem:[%s760_s3 + $0x8] sm:$0xff]  ;;  %v205_v52 = vld [vmem:[%s760_s3] sm:$0xff]  ;;  %v59_v63 = vld [vmem:[#allocation3 + $0x28] sm:$0x1]  ;;  %52 = vst.msk [vmem:[#allocation2] sm:$0xff] %vm51_vm11, %v605_v1  ;;  %s607_s23 = smov 8  }
  0x11   :  { %86 = vmatpush.msra.mxu0 %v54_v2  ;;  %167 = vmatpush.msra.mxu2 %v144_v23  ;;  %v480_v56 = vld [vmem:[%s760_s3 + $0x20] ss:$0 sm:$0xff]  ;;  %v55_v2 = vld [vmem:[#allocation3 + $0x8] sm:$0xff]  ;;  %v482_v1 = vld [vmem:[%s760_s3 + $0x48] ss:$0 sm:$0xff]  ;;  %s608_s24 = smov [#allocation8]  }
  0x12   :  { %455 = vmatmul.msk.f32.vlgmr.msra.gmra.mxu0 %vm60_vm1, %v650_v3  ;;  %229 = vmatpush.msra.mxu3 %v207_v50  ;;  %v259_v62 = vld [vmem:[%s759_s2] sm:$0xff]  ;;  %s443_s29 = sshll.u32 %s762_s5, 4  ;;  %s444_s29 = int_to_ptr.hbm [resolvable:$true] %s443_s29 }
  0x13   :  { %168 = vmatpush.msra.mxu2 %v143_v24  ;;  %v57_v0 = vld [vmem:[#allocation3 + $0x18] sm:$0xff]  ;;  %279 = vmatpush.msrb.mxu0 %v259_v62 }
  0x14   :  { %230 = vmatpush.msra.mxu3 %v206_v51  ;;  %456 = vmatpush.msk.msra.mxu1 %vm64_vm0, %v59_v63 }
  0x15   :  { %169 = vmatpush.msra.mxu2 %v142_v25 }
  0x16   :  { %231 = vmatpush.msra.mxu3 %v205_v52  ;;  %105 = vmatpush.msra.mxu1 %v57_v0 }
  0x18   :  { %106 = vmatpush.msra.mxu1 %v55_v2 }
  0x19   :  { %457 = vmatmul.msk.f32.vlgmr.msra.gmra.mxu1 %vm60_vm1, %v650_v3 }
  0x8f   :  { %v88_v4 = vpop.f32.mrf.mxu0 }
  0x90   :  { %483 = vtanh.f32 %v88_v4  ;;  %v458_v6 = vmul.f32 -1.442695, %v88_v4  ;;  %v703_v4 = vld [vmem:[#allocation6] sm:$0xff] }
  0x92   :  { %485 = vpow2.f32 %v458_v6 }
  0x96   :  { %v484_v5 = vpop.eup %483 }
  0x97   :  { %132 = vrot.lane.b32.xlu0 %v484_v5, %s601_s30 }
  0x98   :  { %v486_v7 = vpop.eup %485 }
  0x99   :  { %v114_v8 = vadd.f32 1.0, %v486_v7 }
  0x9b   :  { %487 = vrcp.f32 %v114_v8  ;;  %v126_v14 = vand.u32 2147483648, %v114_v8  ;;  %vm120_vm3 = vweird.f32 %v114_v8  ;;  %v124_v15 = vand.u32 2147483647, %v114_v8 }
  0x9d   :  { %v127_v17 = vor.u32 1.1754944e-38, %v126_v14  ;;  %vm125_vm5 = vcmp.eq.f32.partialorder %v124_v15, 8.507059e+37 }
  0xa1   :  { %v488_v9 = vpop.eup %487 }
  0xa2   :  { %v116_v10 = vmul.f32 %v488_v9, %v114_v8  ;;  %vm121_vm2 = vweird.f32 %v488_v9 }
  0xa3   :  { %vm122_vm4 = vmor %vm120_vm3, %vm121_vm2 }
  0xa4   :  { %v117_v11 = vsub.f32 1.0, %v116_v10 }
  0xa6   :  { %v118_v12 = vmul.f32 %v488_v9, %v117_v11 }
  0xa8   :  { %v119_v13 = vadd.f32 %v488_v9, %v118_v12 }
  0xaa   :  { %v123_v16 = vsel %vm122_vm4, %v488_v9, %v119_v13  ;;  %v108_v9 = vpop.f32.mrf.mxu1  ;;  %vm251_vm4 = vcmask 195712  }
  0xab   :  { %v128_v19 = vsel %vm125_vm5, %v127_v17, %v123_v16  ;;  %vm256_vm5 = vcmask 326912  }
 0x109   :  { %v133_v18 = vpop.permute.xlu0 %132 }
 0x10a   :  { %v135_v20 = vmul.f32 %v133_v18, %v128_v19 }
 0x10c   :  { %489 = vtanh.f32 %v135_v20 }
 0x112   :  { %v490_v21 = vpop.eup %489 }
 0x113   :  { %138 = vrot.lane.b32.xlu0 %v490_v21, %s602_s0 }
 0x185   :  { %v139_v26 = vpop.permute.xlu0 %138 }
 0x186   :  { %v141_v27 = vmul.f32 %v139_v26, %v128_v19 }
 0x188   :  { %149 = vrot.lane.b32.xlu1 %v141_v27, %s603_s14 }
 0x1fa   :  { %v150_v28 = vpop.permute.xlu1 %149 }
 0x1fb   :  { %459 = vmatmul.msk.f32.vlgmr.msra.gmra.mxu2 %vm151_vm6, %v150_v28  ;;  %v319_v28 = vld [vmem:[%s759_s2 + $0x48] sm:$0xff] }
 0x1fc   :  { %339 = vmatpush.msrb.mxu1 %v319_v28 }
 0x27e   :  { %v171_v30 = vpop.f32.mrf.mxu2 }
 0x27f   :  { %v172_v31 = vadd.f32 %v479_v29, %v171_v30  ;;  %v318_v29 = vld [vmem:[%s759_s2 + $0x40] sm:$0xff]  ;;  %v317_v30 = vld [vmem:[%s759_s2 + $0x38] sm:$0xff] }
 0x280   :  { %340 = vmatpush.msrb.mxu1 %v318_v29 }
 0x281   :  { %491 = vtanh.f32 %v172_v31  ;;  %v460_v33 = vmul.f32 -1.442695, %v172_v31  ;;  %v316_v31 = vld [vmem:[%s759_s2 + $0x30] sm:$0xff] }
 0x282   :  { %341 = vmatpush.msrb.mxu1 %v317_v30 }
 0x283   :  { %493 = vpow2.f32 %v460_v33 }
 0x284   :  { %342 = vmatpush.msrb.mxu1 %v316_v31 }
 0x287   :  { %v492_v32 = vpop.eup %491 }
 0x288   :  { %195 = vrot.lane.b32.xlu1 %v492_v32, %s601_s30 }
 0x289   :  { %v494_v34 = vpop.eup %493 }
 0x28a   :  { %v177_v35 = vadd.f32 1.0, %v494_v34 }
 0x28c   :  { %495 = vrcp.f32 %v177_v35  ;;  %v189_v41 = vand.u32 2147483648, %v177_v35  ;;  %vm183_vm8 = vweird.f32 %v177_v35  ;;  %v187_v42 = vand.u32 2147483647, %v177_v35 }
 0x28e   :  { %v190_v44 = vor.u32 1.1754944e-38, %v189_v41  ;;  %vm188_vm10 = vcmp.eq.f32.partialorder %v187_v42, 8.507059e+37 }
 0x292   :  { %v496_v36 = vpop.eup %495 }
 0x293   :  { %v179_v37 = vmul.f32 %v496_v36, %v177_v35  ;;  %vm184_vm7 = vweird.f32 %v496_v36  ;;  %v481_v35 = vld [vmem:[%s759_s2 + $0x50] ss:$0 sm:$0xff] }
 0x294   :  { %vm185_vm9 = vmor %vm183_vm8, %vm184_vm7  ;;  %vm429_vm7 = vcmask 261312   ;;  %vm434_vm8 = vcmask 392512  }
 0x295   :  { %v180_v38 = vsub.f32 1.0, %v179_v37 }
 0x297   :  { %v181_v39 = vmul.f32 %v496_v36, %v180_v38 }
 0x299   :  { %v182_v40 = vadd.f32 %v496_v36, %v181_v39 }
 0x29b   :  { %v186_v43 = vsel %vm185_vm9, %v496_v36, %v182_v40 }
 0x29c   :  { %v191_v46 = vsel %vm188_vm10, %v190_v44, %v186_v43 }
 0x2fa   :  { %v196_v45 = vpop.permute.xlu1 %195 }
 0x2fb   :  { %v198_v47 = vmul.f32 %v196_v45, %v191_v46 }
 0x2fd   :  { %497 = vtanh.f32 %v198_v47 }
 0x303   :  { %v498_v48 = vpop.eup %497 }
 0x304   :  { %201 = vrot.lane.b32.xlu2 %v498_v48, %s602_s0 }
 0x35e   :  { %v202_v53 = vpop.permute.xlu2 %201 }
 0x35f   :  { %v204_v54 = vmul.f32 %v202_v53, %v191_v46 }
 0x361   :  { %212 = vrot.lane.b32.xlu2 %v204_v54, %s603_s14 }
 0x3bb   :  { %v213_v55 = vpop.permute.xlu2 %212 }
 0x3bc   :  { %461 = vmatmul.msk.f32.vlgmr.msra.gmra.mxu3 %vm151_vm6, %v213_v55  ;;  %v381_v55 = vld [vmem:[%s760_s3 + $0x40] sm:$0xff] }
 0x3bd   :  { %401 = vmatpush.msrb.mxu2 %v381_v55 }
 0x43f   :  { %v233_v57 = vpop.f32.mrf.mxu3 }
 0x440   :  { %v692_v58 = vadd.f32 %v480_v56, %v233_v57  ;;  %v380_v56 = vld [vmem:[%s760_s3 + $0x38] sm:$0xff]  ;;  %v379_v57 = vld [vmem:[%s760_s3 + $0x30] sm:$0xff] }
 0x441   :  { %402 = vmatpush.msrb.mxu2 %v380_v56 }
 0x442   :  { %v237_v59 = vmul.f32 0.5, %v692_v58 }
 0x443   :  { %403 = vmatpush.msrb.mxu2 %v379_v57 }
 0x444   :  { %v238_v60 = vmul.f32 1.442695, %v237_v59  ;;  %v378_v59 = vld [vmem:[%s760_s3 + $0x28] sm:$0xff]  ;;  %s441_s3 = sshll.u32 %s608_s24, 4  ;;  %s442_s3 = int_to_ptr.vmem [resolvable:$true] %s441_s3 }
 0x445   :  { %404 = vmatpush.msrb.mxu2 %v378_v59 }
 0x446   :  { %499 = vpow2.f32 %v238_v60 }
 0x44c   :  { %v500_v61 = vpop.eup %499 }
 0x44d   :  { %241 = vrot.lane.b32.xlu0 %v500_v61, %s604_s28 }
 0x4bf   :  { %v242_v5 = vpop.permute.xlu0 %241 }
 0x4c0   :  { %v244_v6 = vmul.f32 %v242_v5, %v703_v4 }
 0x4c2   :  { %v245_v7 = vadd.f32 %v244_v6, %v692_v58 }
 0x4c4   :  { %258 = vst.msk [vmem:[#allocation2] sm:$0xff] %vm51_vm11, %v245_v7 }
 0x4c5   :  { %246 = vst.msk [vmem:[#allocation8] sm:$0xff] %vm51_vm11, %v245_v7 }
 0x4cb   :  { %v260_v8 = vld [vmem:[#allocation2] sm:$0xff] }
 0x4cc   :  { %462 = vmatmul.msk.f32.vlgmr.msrb.gmra.mxu0 %vm51_vm11, %v260_v8 }
 0x549   :  { %v281_v10 = vpop.f32.mrf.mxu0 }
 0x54a   :  { %v284_v11 = vadd.f32 %v281_v10, %v108_v9 }
 0x54c   :  { %501 = vtanh.f32 %v284_v11  ;;  %v463_v3 = vmul.f32 -1.442695, %v284_v11 }
 0x54e   :  { %503 = vpow2.f32 %v463_v3 }
 0x552   :  { %v502_v12 = vpop.eup %501 }
 0x553   :  { %306 = vrot.lane.b32.xlu1 %v502_v12, %s601_s30 }
 0x554   :  { %v504_v13 = vpop.eup %503 }
 0x555   :  { %v288_v14 = vadd.f32 1.0, %v504_v13 }
 0x557   :  { %505 = vrcp.f32 %v288_v14  ;;  %v300_v20 = vand.u32 2147483648, %v288_v14  ;;  %vm294_vm13 = vweird.f32 %v288_v14  ;;  %v298_v21 = vand.u32 2147483647, %v288_v14 }
 0x559   :  { %v301_v23 = vor.u32 1.1754944e-38, %v300_v20  ;;  %vm299_vm15 = vcmp.eq.f32.partialorder %v298_v21, 8.507059e+37 }
 0x55d   :  { %v506_v15 = vpop.eup %505 }
 0x55e   :  { %v290_v16 = vmul.f32 %v506_v15, %v288_v14  ;;  %vm295_vm12 = vweird.f32 %v506_v15 }
 0x55f   :  { %vm296_vm14 = vmor %vm294_vm13, %vm295_vm12 }
 0x560   :  { %v291_v17 = vsub.f32 1.0, %v290_v16 }
 0x562   :  { %v292_v18 = vmul.f32 %v506_v15, %v291_v17 }
 0x564   :  { %v293_v19 = vadd.f32 %v506_v15, %v292_v18 }
 0x566   :  { %v297_v22 = vsel %vm296_vm14, %v506_v15, %v293_v19 }
 0x567   :  { %v302_v25 = vsel %vm299_vm15, %v301_v23, %v297_v22 }
 0x5c5   :  { %v307_v24 = vpop.permute.xlu1 %306 }
 0x5c6   :  { %v309_v26 = vmul.f32 %v307_v24, %v302_v25 }
 0x5c8   :  { %507 = vtanh.f32 %v309_v26 }
 0x5ce   :  { %v508_v27 = vpop.eup %507 }
 0x5cf   :  { %312 = vrot.lane.b32.xlu2 %v508_v27, %s602_s0 }
 0x629   :  { %v313_v32 = vpop.permute.xlu2 %312 }
 0x62a   :  { %v315_v33 = vmul.f32 %v313_v32, %v302_v25 }
 0x62c   :  { %323 = vrot.lane.b32.xlu0 %v315_v33, %s603_s14 }
 0x69e   :  { %v324_v34 = vpop.permute.xlu0 %323 }
 0x69f   :  { %464 = vmatmul.msk.f32.vlgmr.msrb.gmra.mxu1 %vm151_vm6, %v324_v34 }
 0x71c   :  { %v344_v36 = vpop.f32.mrf.mxu1 }
 0x71d   :  { %v345_v37 = vadd.f32 %v481_v35, %v344_v36 }
 0x71f   :  { %509 = vtanh.f32 %v345_v37  ;;  %v465_v39 = vmul.f32 -1.442695, %v345_v37 }
 0x721   :  { %511 = vpow2.f32 %v465_v39 }
 0x725   :  { %v510_v38 = vpop.eup %509 }
 0x726   :  { %368 = vrot.lane.b32.xlu1 %v510_v38, %s601_s30 }
 0x727   :  { %v512_v40 = vpop.eup %511 }
 0x728   :  { %v350_v41 = vadd.f32 1.0, %v512_v40 }
 0x72a   :  { %513 = vrcp.f32 %v350_v41  ;;  %v362_v47 = vand.u32 2147483648, %v350_v41  ;;  %vm356_vm1 = vweird.f32 %v350_v41  ;;  %v360_v48 = vand.u32 2147483647, %v350_v41 }
 0x72c   :  { %v363_v50 = vor.u32 1.1754944e-38, %v362_v47  ;;  %vm361_vm3 = vcmp.eq.f32.partialorder %v360_v48, 8.507059e+37 }
 0x730   :  { %v514_v42 = vpop.eup %513 }
 0x731   :  { %v352_v43 = vmul.f32 %v514_v42, %v350_v41  ;;  %vm357_vm0 = vweird.f32 %v514_v42 }
 0x732   :  { %vm358_vm2 = vmor %vm356_vm1, %vm357_vm0 }
 0x733   :  { %v353_v44 = vsub.f32 1.0, %v352_v43 }
 0x735   :  { %v354_v45 = vmul.f32 %v514_v42, %v353_v44 }
 0x737   :  { %v355_v46 = vadd.f32 %v514_v42, %v354_v45 }
 0x739   :  { %v359_v49 = vsel %vm358_vm2, %v514_v42, %v355_v46 }
 0x73a   :  { %v364_v52 = vsel %vm361_vm3, %v363_v50, %v359_v49 }
 0x798   :  { %v369_v51 = vpop.permute.xlu1 %368 }
 0x799   :  { %v371_v53 = vmul.f32 %v369_v51, %v364_v52 }
 0x79b   :  { %515 = vtanh.f32 %v371_v53 }
 0x7a1   :  { %v516_v54 = vpop.eup %515 }
 0x7a2   :  { %374 = vrot.lane.b32.xlu2 %v516_v54, %s602_s0 }
 0x7aa   :  { %248 = vrot.lane.b32.xlu2 %v692_v58, %s599_s27  ;;  %s606_s27 = smov 24  }
 0x7fc   :  { %v375_v60 = vpop.permute.xlu2 %374 }
 0x7fd   :  { %v377_v61 = vmul.f32 %v375_v60, %v364_v52 }
 0x7ff   :  { %385 = vrot.lane.b32.xlu0 %v377_v61, %s603_s14 }
 0x804   :  { %v249_v62 = vpop.permute.xlu2 %248 }
 0x805   :  { %252 = vst.msk [vmem:[#allocation8] sm:$0xff] %vm251_vm4, %v249_v62 }
 0x807   :  { %253 = vrot.lane.b32.xlu0 %v692_v58, %s606_s27 }
 0x871   :  { %v386_v63 = vpop.permute.xlu0 %385 }
 0x872   :  { %466 = vmatmul.msk.f32.vlgmr.msrb.gmra.mxu2 %vm151_vm6, %v386_v63  ;;  %vm423_vm6 = vcmask 130112  }
 0x879   :  { %v254_v0 = vpop.permute.xlu0 %253 }
 0x87a   :  { %257 = vst.msk [vmem:[#allocation8] sm:$0xff] %vm256_vm5, %v254_v0 }
 0x8f5   :  { %v406_v2 = vpop.f32.mrf.mxu2 }
 0x8f6   :  { %v407_v5 = vadd.f32 %v482_v1, %v406_v2 }
 0x8f8   :  { %v410_v6 = vmul.f32 0.5, %v407_v5  ;;  %431 = vrot.lane.b32.xlu0 %v407_v5, %s603_s14  ;;  %426 = vrot.lane.b32.xlu2 %v407_v5, %s606_s27 }
 0x8fa   :  { %v411_v7 = vmul.f32 1.442695, %v410_v6 }
 0x8fc   :  { %517 = vpow2.f32 %v411_v7 }
 0x902   :  { %v518_v8 = vpop.eup %517 }
 0x903   :  { %v413_v58 = vmul.f32 %v518_v8, %v703_v4 }
 0x905   :  { %415 = vrot.lane.b32.xlu1 %v413_v58, %s604_s28 }
 0x952   :  { %v427_v12 = vpop.permute.xlu2 %426 }
 0x96a   :  { %v432_v4 = vpop.permute.xlu0 %431 }
 0x977   :  { %v416_v9 = vpop.permute.xlu1 %415 }
 0x978   :  { %v418_v10 = vadd.f32 %v416_v9, %v407_v5 }
 0x97a   :  { %420 = vrot.lane.b32.xlu1 %v418_v10, %s607_s23 }
 0x9ec   :  { %v421_v11 = vpop.permute.xlu1 %420 }
 0x9ed   :  { %424 = vst.msk [vmem:[#allocation8] sm:$0xff] %vm423_vm6, %v421_v11 }
 0x9ee   :  { %430 = vst.msk [vmem:[#allocation8] sm:$0xff] %vm429_vm7, %v427_v12 }
 0x9ef   :  { %435 = vst.msk [vmem:[#allocation8] sm:$0xff] %vm434_vm8, %v432_v4 }
 0x9f0   :  { %446 = dma.vmem_to_hbm [thread:$0]  %s442_s3, 128, %s444_s29, [#allocation5]  }
 0x9f1   :  { %595 = dma.done.wait [#allocation5], 128  }
 0x9f2   :  { %596 = vsyncadd [#allocation5], 4294967168 }
 0x9f3   :  { %451 = vsyncpa [#allocation4], 1 }
 0x9f4   :  { %452 = vsyncpa [#allocation7], 1 }
 0x9f5   :  { %453 = vsyncpa [#allocation5], 1 }

</bundles_post_ra>
